<compile_context>
chip_gen: v7x
topology: tpu7x:2x2x1
jax: 0.10.0
libtpu: 0.0.40
codegen_flags: <defaults>
</compile_context>

<pallas_src>
import jax
import jax.numpy as jnp
from jax.experimental import pallas as pl
from jax.experimental.pallas import tpu as pltpu

LANE = 128


def _round_up(v, m):
    return -(-v // m) * m


def im2col_matmul_kernel(p_ref, w_ref, b_ref, o_ref):
    """Single fused conv-as-matmul block.

    p_ref: (KKC, Mb)  im2col patches: contraction on sublanes, M on lanes
    w_ref: (Co, KKC)  flattened HWIO weights (resident across the grid)
    b_ref: (Co, 1)    bias (broadcast along lanes)
    o_ref: (Co, Mb)   lane-dense output block (wide unmasked stores)
    """
    acc = jnp.dot(w_ref[...], p_ref[...], preferred_element_type=jnp.float32)
    o_ref[...] = (acc + b_ref[...]).astype(o_ref.dtype)


def _choose_m_block(M, KKC, Co, itemsize, vmem_budget_bytes=8 << 20):
    """Pick the lane-block size.

    Largest multiple of 128 that (a) keeps the double-buffered input + output
    blocks under a conservative VMEM budget (safe on v5e/v6e/v7x defaults),
    (b) leaves >= 2 grid blocks so v7x's two TensorCores both run, and
    (c) divides M exactly whenever possible (avoids a pad copy of the 2.25x
    patch matrix in HBM).
    """
    bytes_per_lane = (2 * _round_up(KKC, 8) + 2 * _round_up(Co, 8)) * itemsize
    cap = max(LANE, (vmem_budget_bytes // bytes_per_lane) // LANE * LANE)
    m_ceil = _round_up(M, LANE)
    target = min(cap, max(LANE, _round_up(-(-m_ceil // 2), LANE)))
    for cand in range(target, LANE - 1, -LANE):
        if M % cand == 0:
            return cand
    return target  # rare: M not a multiple of 128 -> small tail pad


def spatial_downsample(x, weight, bias, *, kernel_size=3, stride=2,
                       compute_dtype=None):
    """x: (B, C, T, H, W). weight: (K, K, C, Co) HWIO. bias: (Co,)."""
    B, C, T, H, W = x.shape
    K = kernel_size
    p = K // 2
    Co = weight.shape[-1]
    Ho = (H + 2 * p - K) // stride + 1
    Wo = (W + 2 * p - K) // stride + 1
    N = B * T
    KKC = K * K * C
    M = N * Ho * Wo

    # b c t h w -> c (b t) h w : channel-major pack; only major dims move.
    xcm = jnp.transpose(x, (1, 0, 2, 3, 4)).reshape(C, N, H, W)
    xpad = jnp.pad(xcm, ((0, 0), (0, 0), (p, p), (p, p)))

    # im2col built directly in the kernel's (KKC, M) lane-dense orientation:
    # tap-major / channel-minor rows (matches weight.reshape(KKC, Co) row-major
    # flattening of HWIO), flattened output index M = (frame, ho, wo) on the
    # lane axis.  The final reshape is a contiguous collapse (no data motion).
    taps = []
    for kh in range(K):
        for kw in range(K):
            taps.append(jax.lax.slice(
                xpad,
                (0, 0, kh, kw),
                (C, N, kh + (Ho - 1) * stride + 1, kw + (Wo - 1) * stride + 1),
                (1, 1, stride, stride)))
    p_t = jnp.stack(taps, axis=0).reshape(KKC, M)        # (K*K*C, M)
    w_t = weight.reshape(KKC, Co).T                      # (Co, K*K*C)
    b_c = bias.astype(jnp.float32).reshape(Co, 1)        # (Co, 1)

    if compute_dtype is not None:  # e.g. bf16 on v6e/v7x: halves the HBM read
        p_t = p_t.astype(compute_dtype)
        w_t = w_t.astype(compute_dtype)

    M_block = _choose_m_block(M, KKC, Co, jnp.dtype(p_t.dtype).itemsize)
    M_pad = _round_up(M, M_block)
    if M_pad != M:  # only when M is not a multiple of 128
        p_t = jnp.pad(p_t, ((0, 0), (0, M_pad - M)))

    out_flat = pl.pallas_call(
        im2col_matmul_kernel,
        out_shape=jax.ShapeDtypeStruct((Co, M_pad), x.dtype),
        grid_spec=pltpu.PrefetchScalarGridSpec(
            num_scalar_prefetch=0,
            grid=(M_pad // M_block,),
            in_specs=[
                pl.BlockSpec((KKC, M_block), lambda m: (0, m)),
                pl.BlockSpec((Co, KKC), lambda m: (0, 0)),   # resident weights
                pl.BlockSpec((Co, 1), lambda m: (0, 0)),     # resident bias
            ],
            out_specs=pl.BlockSpec((Co, M_block), lambda m: (0, m)),
        ),
        compiler_params=pltpu.CompilerParams(
            dimension_semantics=("parallel",),
        ),
    )(p_t, w_t, b_c)

    # (Co, M) -> (Co, B, T, Ho, Wo) -> (B, Co, T, Ho, Wo): only the two leading
    # (major) dims swap; Ho/Wo stay minor, so no real minor-axis transpose.
    out = out_flat[:, :M].reshape(Co, B, T, Ho, Wo)
    return jnp.transpose(out, (1, 0, 2, 3, 4))


if __name__ == "__main__":
    # Module config: dim=4, dim_out=8, kernel_size=3
    dim, dim_out, K = 4, 8, 3
    B, T, H, W = 2, 4, 16, 16

    key = jax.random.PRNGKey(0)
    kx, kw, kb = jax.random.split(key, 3)

    # Deterministic init mirroring PyTorch Conv default (uniform +-1/sqrt(fan_in))
    fan_in = dim * K * K
    bound = 1.0 / (fan_in ** 0.5)
    weight = jax.random.uniform(kw, (K, K, dim, dim_out), jnp.float32, -bound, bound)
    bias = jax.random.uniform(kb, (dim_out,), jnp.float32, -bound, bound)
    x = jax.random.normal(kx, (B, dim, T, H, W), jnp.float32)

    out = spatial_downsample(x, weight, bias, kernel_size=K, stride=2)
    out = jax.block_until_ready(out)

    # Shape check: spatial dims halved, time preserved, channels -> dim_out
    assert out.shape == (B, dim_out, T, H // 2, W // 2), out.shape

    # Numerical check against XLA's conv (per-frame 2D conv, stride 2, pad k//2)
    p = K // 2
    xf = jnp.transpose(x, (0, 2, 3, 4, 1)).reshape(B * T, H, W, dim)
    ref = jax.lax.conv_general_dilated(
        xf, weight, window_strides=(2, 2), padding=((p, p), (p, p)),
        dimension_numbers=("NHWC", "HWIO", "NHWC"),
    ) + bias
    ref = jnp.transpose(ref.reshape(B, T, H // 2, W // 2, dim_out), (0, 4, 1, 2, 3))
    assert jnp.allclose(out, ref, atol=1e-4, rtol=1e-4)

    # bf16 compute path (v6e/v7x HBM-traffic optimization); f32 accumulation,
    # so only input-rounding-level error vs the f32 reference.
    out_bf16 = spatial_downsample(x, weight, bias, kernel_size=K, stride=2,
                                  compute_dtype=jnp.bfloat16)
    out_bf16 = jax.block_until_ready(out_bf16)
    assert out_bf16.shape == ref.shape
    assert jnp.allclose(out_bf16, ref, atol=5e-2, rtol=5e-2)

    print("KERNEL_OK")
</pallas_src>

<mosaic_0001>
module attributes {stable_mosaic.version = 11 : i64} {
  func.func @im2col_matmul_kernel(%arg0: i32, %arg1: memref<36x256xf32, #tpu.memory_space<vmem>>, %arg2: memref<8x36xf32, #tpu.memory_space<vmem>>, %arg3: memref<8x1xf32, #tpu.memory_space<vmem>>, %arg4: memref<8x256xf32, #tpu.memory_space<vmem>>) attributes {dimension_semantics = [#tpu.dimension_semantics<parallel>], iteration_bounds = array<i64: 2>, scalar_prefetch = 0 : i64, scratch_operands = 0 : i64, tpu.core_type = #tpu.core_type<tc>, window_params = [{transform_indices = @transform_0, window_bounds = array<i64: 36, 256>}, {pipeline_mode = #tpu.pipeline_mode<synchronous>, transform_indices = @transform_1, window_bounds = array<i64: 8, 36>}, {pipeline_mode = #tpu.pipeline_mode<synchronous>, transform_indices = @transform_2, window_bounds = array<i64: 8, 1>}, {transform_indices = @transform_3, window_bounds = array<i64: 8, 256>}]} {
    %c0 = arith.constant 0 : index
    %c0_0 = arith.constant 0 : index
    %0 = vector.load %arg2[%c0, %c0_0] : memref<8x36xf32, #tpu.memory_space<vmem>>, vector<8x36xf32>
    %c0_1 = arith.constant 0 : index
    %c0_2 = arith.constant 0 : index
    %1 = vector.load %arg1[%c0_1, %c0_2] : memref<36x256xf32, #tpu.memory_space<vmem>>, vector<36x256xf32>
    %cst = arith.constant dense<0.000000e+00> : vector<8x256xf32>
    %2 = tpu.matmul %0, %1, %cst {dimension_numbers = #tpu.dot_dimension_numbers<[1], [0], [0], [1], [0, 0, 1, 1], [], []>} : vector<8x36xf32>, vector<36x256xf32>, vector<8x256xf32> -> vector<8x256xf32>
    %c0_3 = arith.constant 0 : index
    %c0_4 = arith.constant 0 : index
    %3 = vector.load %arg3[%c0_3, %c0_4] : memref<8x1xf32, #tpu.memory_space<vmem>>, vector<8x1xf32>
    %4 = vector.broadcast %3 : vector<8x1xf32> to vector<8x256xf32>
    %5 = arith.addf %2, %4 : vector<8x256xf32>
    %c0_5 = arith.constant 0 : index
    %c0_6 = arith.constant 0 : index
    %6 = vector.load %arg4[%c0_5, %c0_6] : memref<8x256xf32, #tpu.memory_space<vmem>>, vector<8x256xf32>
    tpu.vector_store %arg4[%c0_5, %c0_6], %5 {strides = array<i32>} : memref<8x256xf32, #tpu.memory_space<vmem>>, vector<8x256xf32>,
    return
  }
  func.func @transform_0(%arg0: i32) -> (i32, i32) {
    %c0_i32 = arith.constant 0 : i32
    %c0_i32_0 = arith.constant 0 : i32
    return %c0_i32, %arg0 : i32, i32
  }
  func.func @transform_1(%arg0: i32) -> (i32, i32) {
    %c0_i32 = arith.constant 0 : i32
    %c0_i32_0 = arith.constant 0 : i32
    %c0_i32_1 = arith.constant 0 : i32
    return %c0_i32, %c0_i32_0 : i32, i32
  }
  func.func @transform_2(%arg0: i32) -> (i32, i32) {
    %c0_i32 = arith.constant 0 : i32
    %c0_i32_0 = arith.constant 0 : i32
    %c0_i32_1 = arith.constant 0 : i32
    return %c0_i32, %c0_i32_0 : i32, i32
  }
  func.func @transform_3(%arg0: i32) -> (i32, i32) {
    %c0_i32 = arith.constant 0 : i32
    %c0_i32_0 = arith.constant 0 : i32
    return %c0_i32, %arg0 : i32, i32
  }
}

</mosaic_0001>

<bundles_post_ra>
// kernel: tpu_custom_call.1
= control target key start
LH: loop header
LB: loop body
LE: loop exit
PB: predicated region body
PF: predicated region fallthrough
CT: control target
= control target key end

     0   :  { %8 = vsyncpa [#allocation3], 0  ;;  %s744_s0 = inlined_call_operand.hbm [shape: f32[36,512], index: 0, kind: input, shape index: {}]   ;;  %s745_s1 = inlined_call_operand.vmem [shape: f32[8,36], index: 1, kind: input, shape index: {}]   ;;  %s746_s2 = inlined_call_operand.vmem [shape: f32[8,1], index: 2, kind: input, shape index: {}]   ;;  %s747_s3 = inlined_call_operand.hbm [shape: f32[8,512], index: 3, kind: output, shape index: {}]  }
   0x1   :  { %10 = vsyncpa [#allocation3 + $0x1], 0 }
   0x2   :  { %11 = vsyncpa [#allocation4], 0 }
   0x3   :  { %13 = vsyncpa [#allocation4 + $0x1], 0  ;;  %s581_s12 = smov 0   ;;  %s583_s13 = smov 0  }
   0x4   :  { %s585_s14 = smov 0   ;;  %s587_s15 = smov 0  }
   0x5 LB: > { %s602_s16 = sadd.s32 4294967295, %s552_s15   ;;  %s377_s17 = sadd.s32 4294967294, %s552_s15   ;;  %s552_s15 = sphi %s587_s15, %s760_s15   ;;  %s548_s14 = sphi %s585_s14, %s759_s14   ;;  %s544_s13 = sphi %s583_s13, %s758_s13   ;;  %s540_s12 = sphi %s581_s12, %s757_s12  }
   0x6   : > { %s606_s18 = sadd.s32 1, %s552_s15   ;;  %s26_s19 = sadd.s32 1, %s548_s14 }
   0x7   : > { %s23_s20 = ssub.s32 %s552_s15, %s606_s18  ;;  %p33_p0 = scmp.ne.s32.totalorder %s548_s14, %s544_s13 }
   0x8   : > { %p24_p1 = scmp.eq.s32.totalorder %s23_s20, 0  ;;  %p34_p2 = scmp.eq.s32.totalorder %s552_s15, 0 }
   0x9   : > { %p39_p3 = scmp.ne.s32.totalorder %s544_s13, %s540_s12  ;;  %p40_p4 = scmp.eq.s32.totalorder %s602_s16, 0 }
   0xa   : > { %s618_s21 = scalar_select %p24_p1, %s548_s14, %s26_s19  }
   0xb   : > { %p35_p5 = por %p34_p2, %p33_p0  ;;  %p620_p6 = por %p40_p4, %p39_p3 }
   0xc   : > { %p105_p7 = scmp.eq.s32.totalorder %s602_s16, 1  ;;  %p111_p8 = scmp.eq.s32.totalorder %s377_s17, 1 }
   0xd   : > { %p416_p10 = scmp.lt.s32.totalorder %s552_s15, 2  ;;  %s137_s25 = sand.u32 1, %s548_s14  }
   0xe   : > { %p627_p11 = por %p105_p7, %p33_p0  ;;  %p631_p12 = por %p111_p8, %p39_p3 }
   0xf   : > { %s392_s26 = sshll.u32 %s552_s15, 8  ;;  %s402_s27 = smul.u32 80, %s137_s25 }
  0x10   : > { %s750_s23 = scalar_select %p627_p11, 1, 0 }
  0x11   : > { %s751_s24 = scalar_select %p631_p12, 1, 0 }
  0x12   : > { %s640_s30 = scalar_lea.hbm %s744_s0, %s392_s26  ;;  %p642_p13 = pnand %p416_p10, %p35_p5 }
  0x13   : > { %s141_s5 = scalar_lea.vmem [#allocation2], %s402_s27  ;;  %s649_s7 = scalar_lea.sflag [#allocation3], %s137_s25 }
  0x14   : > { %s148_s6 = sshll.u32 %s141_s5, 4  ;;  %s456_s8 = scalar_lea.hbm %s640_s30, 1280  ;;  %s646_s6 = int_to_ptr.vmem [resolvable:$true] %s148_s6 }
  0x15   : > { %p457_p1 = scmp.ne.s32.totalorder %s640_s30, %s456_s8  ;;  %p458_p2 = pneg %p642_p13 }
  0x16   : > { %s461_s11 = scalar_lea.hbm %s744_s0, 2560  ;;  %p462_p5 = scmp.lt.u32.totalorder %s640_s30, %s744_s0 }
  0x17   : > { %p459_p3 = pnand %p458_p2, %p457_p1  ;;  %p463_p7 = scmp.lt.u32.totalorder %s461_s11, %s456_s8 }
  0x18   : > { %p465_p10 = scmp.lt.u32.totalorder %s456_s8, %s640_s30 }
  0x19   : > { %p460_p4 = pneg %p459_p3  ;;  %p464_p8 = por %p463_p7, %p462_p5 }
  0x1b   : > { %p466_p9 = por %p465_p10, %p464_p8 }
  0x1d   : > { %p467_p0 = pnand %p466_p9, %p460_p4 }
  0x1f   : > { %470 = shalt.err (!%p467_p0)
}
  0x20   : > { %s471_s20 = scalar_lea.vmem %s646_s6, 1280  ;;  %s554_s25 = smov [#allocation2]  }
  0x21   : > { %p472_p1 = scmp.ne.s32.totalorder %s646_s6, %s471_s20  ;;  %s476_s26 = sshll.u32 %s554_s25, 4  ;;  %s477_s26 = int_to_ptr.vmem [resolvable:$false] %s476_s26 }
  0x22   : > { %s478_s27 = scalar_lea.vmem %s477_s26, 2560  ;;  %p479_p11 = scmp.lt.s32.totalorder %s646_s6, %s477_s26 }
  0x23   : > { %p474_p3 = pnand %p472_p1, %p458_p2  ;;  %p480_p5 = scmp.lt.s32.totalorder %s478_s27, %s471_s20 }
  0x25   : > { %p475_p12 = pneg %p474_p3  ;;  %p481_p7 = por %p480_p5, %p479_p11 }
  0x27   : > { %p482_p8 = pnand %p481_p7, %p475_p12 }
  0x29   : > { %485 = shalt.err (!%p482_p8)
}
  0x2a   : > { %s555_s28 = smov 512   ;;  %s556_s29 = smov 256  }
  0x2b   : > { %s557_s5 = smov 16   ;;  %p156_p9 = scmp.lt.s32.totalorder %s552_s15, 3 }
  0x2c   : > { %411 = dma.hbm_to_vmem [thread:$0]  (!%p642_p13), %s640_s30, 1280, %s646_s6, %s649_s7, %s555_s28, %s556_s29, %s557_s5  }
  0x2d   : > { %p753_p0 = scmp.ge.s32.totalorder %s552_s15, 1 }
  0x2f   : > { %p157_p2 = pnand %p753_p0, %p156_p9 }
  0x30   : > { %s681_s8 = sand.u32 (!%p157_p2), 1, %s544_s13  }
  0x31   : > { %160 = sbr.rel (%p157_p2) target bundleno = 299 (0x12b), region = 32  ;;  %s163_s10 = scalar_lea.sflag (!%p157_p2), [#allocation3], %s681_s8 }
  0x32   : > { %s403_s9 = smul.u32 (!%p157_p2), 80, %s681_s8 }
  0x34   : > { %s166_s11 = scalar_lea.vmem (!%p157_p2), [#allocation2], %s403_s9 }
  0x38   : > { %531 = dma.done.wait (%p620_p6), %s163_s10, 1280  }
  0x39   : > { %533 = vsyncadd (%p620_p6), %s163_s10, 4294966016  ;;  %v558_v0 = vmov 0.0   ;;  %v559_v1 = vmov 0   ;;  %v193_v2 = vld [vmem:[%s166_s11 + $0x8] sm:$0xff]  ;;  %v195_v3 = vld [vmem:[%s166_s11 + $0x18] sm:$0xff]  ;;  %vm212_vm0 = vcmask 1043456  }
  0x3a   : > { %283 = vmatprep.mubr.f32.mxu0 %v558_v0  ;;  %455 = vset.pattern.permute.xlu0 %v559_v1  ;;  %v192_v4 = vld [vmem:[%s166_s11] sm:$0xff]  ;;  %v394_v5 = vpack.c.bf16 %v195_v3, %v193_v2  ;;  %v194_v6 = vld [vmem:[%s166_s11 + $0x10] sm:$0xff]  ;;  %v197_v7 = vld [vmem:[%s166_s11 + $0x28] sm:$0xff]  ;;  %vm208_vm1 = vcmask 293888   ;;  %s383_s7 = sshll.u32 %s681_s8, 4  ;;  %s393_s17 = sshll.u32 %s602_s16, 8 }
  0x3b   : > { %v199_v8 = vld [vmem:[%s166_s11 + $0x38] sm:$0xff]  ;;  %v396_v9 = vpack.c.bf16 %v194_v6, %v192_v4  ;;  %v196_v11 = vld [vmem:[%s166_s11 + $0x20] sm:$0xff]  ;;  %v198_v12 = vld [vmem:[%s166_s11 + $0x30] sm:$0xff]  ;;  %s188_s19 = scalar_lea.vmem [#allocation5], %s383_s7  ;;  %s700_s27 = scalar_lea.hbm %s747_s3, %s393_s17 }
  0x3c   : > { %v398_v10 = vpack.c.bf16 %v199_v8, %v197_v7  ;;  %395 = vmatprep.subr.bf16.mxu0 %v394_v5  ;;  %v202_v13 = vld [vmem:[%s746_s2] sm:$0xff]  ;;  %v400_v14 = vpack.c.bf16 %v198_v12, %v196_v11  ;;  %v201_v15 = vld [vmem:[%s166_s11 + $0x48] sm:$0xf]  ;;  %s307_s20 = sshll.u32 %s188_s19, 4  ;;  %s293_s28 = scalar_lea.sflag [#allocation4], %s681_s8  ;;  %s702_s20 = int_to_ptr.vmem [resolvable:$true] %s307_s20 }
  0x3d   : > { %397 = vmatpush1.bf16.msra.mxu0 %v396_v9  ;;  %205 = vperm.xlu0 %455, %v202_v13   ;;  %v200_v16 = vld [vmem:[%s166_s11 + $0x40] sm:$0xf]  ;;  %s486_s16 = scalar_lea.vmem %s702_s20, 256  ;;  %p754_p11 = scmp.ne.s32.totalorder %s750_s23, 0 }
  0x3e   : > { %399 = vmatprep.subr.bf16.mxu0 %v398_v10  ;;  %v191_v17 = vld [vmem:[%s745_s1] sm:$0xff]  ;;  %p487_p6 = scmp.ne.s32.totalorder %s702_s20, %s486_s16  ;;  %s560_s29 = smov [#allocation5]  }
  0x3f   : > { %s490_s5 = sshll.u32 %s560_s29, 4  ;;  %s491_s5 = int_to_ptr.vmem [resolvable:$false] %s490_s5 }
  0x40   : > { %p488_p12 = pnand %p487_p6, %p754_p11  ;;  %s492_s9 = scalar_lea.vmem %s491_s5, 512 }
  0x41   : > { %401 = vmatpush1.bf16.msra.mxu0 %v400_v14  ;;  %p493_p4 = scmp.lt.s32.totalorder %s702_s20, %s491_s5  ;;  %p494_p10 = scmp.lt.s32.totalorder %s492_s9, %s486_s16 }
  0x42   : > { %384 = vmatprep.subr.msk.mxu0 %vm212_vm0, %v201_v15  ;;  %p489_p13 = pneg %p488_p12 }
  0x43   : > { %p495_p1 = por %p494_p10, %p493_p4 }
  0x45   : > { %385 = vmatpush1.msk.msra.mxu0 %vm212_vm0, %v200_v16  ;;  %p496_p3 = pnand %p495_p1, %p489_p13 }
  0x46   : > { %386 = vmatmul.mubr.msk.f32.vlgmr.msra.gmra.mrb[0].mxu0 %vm208_vm1, %v191_v17 }
  0xbc   : > { %v206_v18 = vpop.permute.xlu0 %205 }
 0x119   : > { %v285_v19 = vpop.f32.mrb[0].mxu0 }
 0x11a   : > { %v286_v20 = vadd.f32 %v285_v19, %v206_v18  ;;  %v287_v21 = vpop.f32.mrb[1].mxu0 }
 0x11b   : > { %v288_v22 = vadd.f32 %v287_v21, %v206_v18 }
 0x11c   : > { %290 = vst [vmem:[%s188_s19] sm:$0xff] %v286_v20 }
 0x11d   : > { %291 = vst [vmem:[%s188_s19 + $0x8] sm:$0xff] %v288_v22 }
 0x11e   : > { %499 = shalt.err (!%p496_p3)
}
 0x11f   : > { %s500_s8 = scalar_lea.hbm %s700_s27, 256  ;;  %s504_s30 = scalar_lea.hbm %s747_s3, 512 }
 0x120   : > { %p501_p5 = scmp.ne.s32.totalorder %s700_s27, %s500_s8  ;;  %p505_p9 = scmp.lt.u32.totalorder %s700_s27, %s747_s3 }
 0x121   : > { %p506_p0 = scmp.lt.u32.totalorder %s504_s30, %s500_s8  ;;  %p508_p6 = scmp.lt.u32.totalorder %s500_s8, %s700_s27 }
 0x122   : > { %p502_p7 = pnand %p501_p5, %p754_p11 }
 0x123   : > { %p507_p2 = por %p506_p0, %p505_p9 }
 0x124   : > { %p503_p8 = pneg %p502_p7 }
 0x125   : > { %p509_p12 = por %p508_p6, %p507_p2 }
 0x127   : > { %p510_p13 = pnand %p509_p12, %p503_p8 }
 0x129   : > { %513 = shalt.err (!%p510_p13)
}
 0x12a   : > { %406 = dma.vmem_to_hbm [thread:$0]  (%p754_p11), %s702_s20, 256, %s700_s27, %s293_s28  }
 0x12b PF: > { %s319_s6 = sand.u32 1, %s540_s12   ;;  %p755_p4 = scmp.ne.s32.totalorder %s751_s24, 0 }
 0x12c   : > { %p756_p10 = scmp.ge.s32.totalorder %s552_s15, 2  ;;  %s320_s7 = scalar_lea.sflag [#allocation4], %s319_s6 }
 0x12e   : > { %p413_p1 = pnand %p756_p10, %p755_p4 }
 0x130   : > { %535 = dma.done.wait (!%p413_p1), %s320_s7, 256  }
 0x131   : > { %537 = vsyncadd (!%p413_p1), %s320_s7, 4294967040  ;;  %p16_p3 = scmp.ge.s32.totalorder %s606_s18, 4   ;;  %s757_s12 = smov %s544_s13 }
 0x132   : > { %s758_s13 = smov %s548_s14  ;;  %s759_s14 = smov %s618_s21 }
 0x133   : > { %s760_s15 = smov %s606_s18  ;;  %18 = sbr.rel (!%p16_p3) target bundleno = 5 (0x5), region = 77 }
 0x13a   :  { %325 = vsyncpa [#allocation3], 1 }
 0x13b   :  { %327 = vsyncpa [#allocation3 + $0x1], 1 }
 0x13c   :  { %328 = vsyncpa [#allocation4], 1 }
 0x13d   :  { %330 = vsyncpa [#allocation4 + $0x1], 1 }

</bundles_post_ra>
